<compile_context>
chip_gen: v7x
topology: tpu7x:2x2x1
jax: 0.10.0
libtpu: 0.0.40
codegen_flags: <defaults>
</compile_context>

<pallas_src>
import jax
import jax.numpy as jnp
from jax.experimental import pallas as pl
from jax.experimental.pallas import tpu as pltpu


# ---------------------------------------------------------------------------
# helpers
# ---------------------------------------------------------------------------
def _pick_tile(dim, max_tile, align):
    """Largest tile <= max_tile that is a multiple of `align` and divides `dim`.
    Falls back to the full dim (always a legal Pallas block)."""
    if dim <= max_tile:
        return dim
    t = (max_tile // align) * align
    while t >= align:
        if dim % t == 0:
            return t
        t -= align
    return dim


def _tpu_budgets():
    """Generation-dependent VMEM / tiling budgets (conservative fallback)."""
    vmem_cap = 64 * 1024 * 1024
    try:
        info = pltpu.get_tpu_info()
        vmem_cap = int(getattr(info, "vmem_capacity_bytes", vmem_cap))
    except Exception:
        pass
    if vmem_cap >= 96 * 1024 * 1024:
        # v5e / v6e class: 128 MiB physical VMEM, store-bound distance kernel.
        return {"vmem_limit": 96 * 1024 * 1024, "max_rows": 8192,
                "max_tile": 1024, "sqdist_mxu": False}
    # v7x class (64 MiB physical): leave double-buffering headroom, and push
    # the distance cross term onto the MXU (kernel is VALU-bound there).
    return {"vmem_limit": 44 * 1024 * 1024, "max_rows": 8192,
            "max_tile": 512, "sqdist_mxu": True}


# ---------------------------------------------------------------------------
# Kernel 1: NEGATIVE pairwise squared distances
#   out[b,i,j] = -|xyz1[b,i] - xyz2[b,j]|^2      (what knn_point's topk wants)
# Coordinates are zero-padded 3 -> 8 in the wrapper (sublane-friendly and makes
# the MXU cross-term matmul shape clean); padded coords contribute nothing.
# ---------------------------------------------------------------------------
def _make_neg_sqdist_kernel(use_mxu):
    def kernel(x1_ref, x2t_ref, out_ref):
        x1 = x1_ref[0]           # [tn, 8]  f32
        x2t = x2t_ref[0]         # [8, ts]  f32
        if use_mxu:
            cross = jnp.dot(x1, x2t, preferred_element_type=jnp.float32)  # MXU
            n1 = jnp.sum(x1 * x1, axis=1, keepdims=True)                   # [tn,1]
            n2 = jnp.sum(x2t * x2t, axis=0, keepdims=True)                 # [1,ts]
            out_ref[0] = 2.0 * cross - n1 - n2
        else:
            d = x1[:, 0:1] - x2t[0:1, :]
            acc = d * d                          # init from coord 0 (no zeros+add)
            for c in (1, 2):                     # static unroll; VPU only
                d = x1[:, c:c + 1] - x2t[c:c + 1, :]
                acc = acc + d * d
            out_ref[0] = -acc
    return kernel


def neg_square_distance_pallas(src, dst, *, max_tile, vmem_limit, use_mxu):
    B, N, _ = src.shape
    S = dst.shape[1]
    src_p = jnp.pad(src, ((0, 0), (0, 0), (0, 5)))                     # [B, N, 8]
    dst_t = jnp.pad(jnp.transpose(dst, (0, 2, 1)), ((0, 0), (0, 5), (0, 0)))  # [B, 8, S]
    tn = _pick_tile(N, max_tile, 8)      # sublane-aligned rows
    ts = _pick_tile(S, max_tile, 128)    # lane-aligned cols
    return pl.pallas_call(
        _make_neg_sqdist_kernel(use_mxu),
        out_shape=jax.ShapeDtypeStruct((B, N, S), jnp.float32),
        grid=(B, N // tn, S // ts),
        in_specs=[pl.BlockSpec((1, tn, 8), lambda b, i, j: (b, i, 0)),
                  pl.BlockSpec((1, 8, ts), lambda b, i, j: (b, 0, j))],
        out_specs=pl.BlockSpec((1, tn, ts), lambda b, i, j: (b, i, j)),
        compiler_params=pltpu.CompilerParams(
            dimension_semantics=("parallel", "parallel", "parallel"),
            vmem_limit_bytes=vmem_limit),
    )(src_p, dst_t)


# ---------------------------------------------------------------------------
# Kernel 2: fused grouped-MLP (all conv1x1+BN(eval)+ReLU layers) + SUM pool
# over the K neighbours.
#   fg   : [B, N, K, 3+Cg] bf16   (concat of xyz_diff and gathered features)
#   fc   : [B, N, Cc]      bf16   (per-point "center" feature; split weight)
#   out  : [B, N, H_last]  (f32 or bf16)
# ---------------------------------------------------------------------------
def _grouped_mlp_pool_kernel(fg_ref, fc_ref, *refs):
    wxg_ref, wc_ref, b0_ref = refs[0], refs[1], refs[2]
    rest = refs[3:-1]                 # (w_i, b_i) pairs of the remaining layers
    out_ref = refs[-1]

    _, tn, K, Cin = fg_ref.shape
    H0 = wxg_ref.shape[1]

    # ---- Layer 0: single MXU matmul over [xyz_diff, grouped-feat] channels ----
    fg = fg_ref[0].reshape(tn * K, Cin)                                   # bf16
    h = jnp.dot(fg, wxg_ref[...], preferred_element_type=jnp.float32)    # [tn*K, H0]
    # Center feature: computed once per point, broadcast over K neighbours.
    hc = jnp.dot(fc_ref[0], wc_ref[...], preferred_element_type=jnp.float32)  # [tn, H0]
    h = h.reshape(tn, K, H0) + hc[:, None, :] + b0_ref[...]
    h = jnp.maximum(h, 0.0)                                               # f32

    # ---- Remaining layers: fused conv1x1 + BN + ReLU ----
    for li in range(0, len(rest), 2):
        w_ref, b_ref = rest[li], rest[li + 1]
        Hi = w_ref.shape[1]
        hmat = jnp.dot(h.reshape(tn * K, h.shape[-1]).astype(jnp.bfloat16),
                       w_ref[...], preferred_element_type=jnp.float32)
        h = jnp.maximum(hmat.reshape(tn, K, Hi) + b_ref[...], 0.0)

    # ---- SUM pool over K (torch.sum(..., dim=-1) in NCHW) ----
    out_ref[0] = jnp.sum(h, axis=1).astype(out_ref.dtype)


def grouped_mlp_sum_pool(feat_grouped, feat_center, layers, out_dtype,
                         *, max_rows, vmem_limit):
    B, N, K, Cin = feat_grouped.shape
    Cc = feat_center.shape[-1]
    w_xg, w_c, b0 = layers[0]
    H0 = w_xg.shape[1]
    H_last = layers[-1][0].shape[1] if len(layers) > 1 else H0

    # keep tn*K activation rows inside the per-generation VMEM budget
    tn = _pick_tile(N, max(8, max_rows // max(K, 1)), 8)
    grid = (B, N // tn)

    weight_args = [w_xg, w_c, b0]
    for (w, bb) in layers[1:]:
        weight_args += [w, bb]

    # advisory cost estimate so XLA schedules the surrounding gather/top_k well
    flops = 2 * B * N * K * Cin * H0 + 2 * B * N * Cc * H0
    hp = H0
    for (w, _) in layers[1:]:
        flops += 2 * B * N * K * hp * w.shape[1]
        hp = w.shape[1]
    bytes_accessed = (feat_grouped.size * 2 + feat_center.size * 2
                      + sum(int(a.size) * a.dtype.itemsize for a in weight_args)
                      + B * N * H_last * jnp.dtype(out_dtype).itemsize)

    def run(single_buffer_weights):
        # Weights never change across the grid (constant index_map); request
        # single buffering so their VMEM reservation is halved.
        kw = {"pipeline_mode": pl.Buffered(1)} if single_buffer_weights else {}
        weight_specs = [pl.BlockSpec(a.shape, lambda b, i: (0, 0), **kw)
                        for a in weight_args]
        return pl.pallas_call(
            _grouped_mlp_pool_kernel,
            out_shape=jax.ShapeDtypeStruct((B, N, H_last), out_dtype),
            grid=grid,
            in_specs=[pl.BlockSpec((1, tn, K, Cin), lambda b, i: (b, i, 0, 0)),
                      pl.BlockSpec((1, tn, Cc), lambda b, i: (b, i, 0)),
                      *weight_specs],
            out_specs=pl.BlockSpec((1, tn, H_last), lambda b, i: (b, i, 0)),
            compiler_params=pltpu.CompilerParams(
                dimension_semantics=("parallel", "parallel"),
                vmem_limit_bytes=vmem_limit),
            cost_estimate=pl.CostEstimate(flops=int(flops), transcendentals=0,
                                          bytes_accessed=int(bytes_accessed)),
        )(feat_grouped, feat_center, *weight_args)

    try:
        return run(True)
    except Exception:
        # pipeline_mode not supported on this JAX/Mosaic build -> default specs
        return run(False)


# ---------------------------------------------------------------------------
# Parameter construction: Conv2d(1x1, bias=False) folded with eval-mode
# BatchNorm2d into a single (W, b); first layer split per input source.
# PyTorch channel order of the concat is [xyz(3), grouped(Cg), center(Cc)].
# ---------------------------------------------------------------------------
def _fold_conv_bn(key, cin, cout, eps=1e-5):
    k1, k2, k3, k4, k5 = jax.random.split(key, 5)
    bound = 1.0 / jnp.sqrt(jnp.float32(cin))
    w = jax.random.uniform(k1, (cin, cout), jnp.float32, -bound, bound)
    gamma = jax.random.uniform(k2, (cout,), jnp.float32, 0.5, 1.5)
    beta = jax.random.uniform(k3, (cout,), jnp.float32, -0.1, 0.1)
    mean = 0.1 * jax.random.normal(k4, (cout,), jnp.float32)
    var = jax.random.uniform(k5, (cout,), jnp.float32, 0.5, 1.5)
    scale = gamma / jnp.sqrt(var + eps)
    return w * scale[None, :], (beta - mean * scale).reshape(1, cout)


def _build_mlp(widths, cin, cg, keys):
    """Layer 0 split into (w_xg[3+cg,H] bf16, w_c[cc,H] bf16, b f32);
    remaining layers as (w bf16, b f32)."""
    layers, c = [], cin
    for i, oc in enumerate(widths):
        w, b = _fold_conv_bn(keys[i], c, oc)
        if i == 0:
            layers.append((w[:3 + cg].astype(jnp.bfloat16),
                           w[3 + cg:].astype(jnp.bfloat16),
                           b))
        else:
            layers.append((w.astype(jnp.bfloat16), b))
        c = oc
    return layers


def init_params(key, in_channel, mlp1, mlp2):
    c1 = in_channel * 2 + 3              # [xyz(3), feat2_grouped(C), feature2(C)]
    c2 = mlp1[-1] + in_channel + 3       # [xyz(3), feat1_grouped(mlp1[-1]), feature1(C)]
    keys = jax.random.split(key, len(mlp1) + len(mlp2))
    return {"mlp1": _build_mlp(mlp1, c1, in_channel, keys[:len(mlp1)]),
            "mlp2": _build_mlp(mlp2, c2, mlp1[-1], keys[len(mlp1):])}


# ---------------------------------------------------------------------------
# Full forward pass (glue in plain JAX; hot paths in the Pallas kernels).
# ---------------------------------------------------------------------------
def flow_embedding_forward(params, pos1, pos2, feature1, feature2,
                           nsample=8, nsample_q=8):
    budgets = _tpu_budgets()
    xyz1, xyz2 = pos1, pos2
    gather = jax.vmap(lambda pts, ids: pts[ids])        # ([S,C],[N,K]) -> [N,K,C]
    # TODO(synk): top_k kNN selection and the neighbour gather have no clean
    # Pallas TPU equivalent here; they stay in XLA (see header for fusion plan).

    # ---- stage 1: group xyz2/feature2 around each xyz1 point, mlp1 + sum pool ----
    negd2 = neg_square_distance_pallas(
        xyz1, xyz2, max_tile=budgets["max_tile"],
        vmem_limit=budgets["vmem_limit"], use_mxu=budgets["sqdist_mxu"])
    _, idx2 = jax.lax.top_k(negd2, nsample_q)            # [B, N, Kq]
    xyz2_g = gather(xyz2, idx2)                          # [B, N, Kq, 3]
    xyz_diff2 = (xyz2_g - xyz1[:, :, None, :]).astype(jnp.bfloat16)
    feat2_g = gather(feature2, idx2).astype(jnp.bfloat16)
    fg1 = jnp.concatenate([xyz_diff2, feat2_g], axis=-1)  # [B, N, Kq, 3+C]
    feat1_new = grouped_mlp_sum_pool(
        fg1, feature2.astype(jnp.bfloat16), params["mlp1"], jnp.bfloat16,
        max_rows=budgets["max_rows"], vmem_limit=budgets["vmem_limit"])

    # ---- stage 2: self-grouping on xyz1, mlp2 + sum pool ----
    negd1 = neg_square_distance_pallas(
        xyz1, xyz1, max_tile=budgets["max_tile"],
        vmem_limit=budgets["vmem_limit"], use_mxu=budgets["sqdist_mxu"])
    _, idx1 = jax.lax.top_k(negd1, nsample)              # [B, N, K]
    xyz1_g = gather(xyz1, idx1)
    xyz_diff1 = (xyz1_g - xyz1[:, :, None, :]).astype(jnp.bfloat16)
    feat1_g = gather(feat1_new, idx1)                    # already bf16
    fg2 = jnp.concatenate([xyz_diff1, feat1_g], axis=-1)  # [B, N, K, 3+mlp1[-1]]
    out = grouped_mlp_sum_pool(
        fg2, feature1.astype(jnp.bfloat16), params["mlp2"], jnp.float32,
        max_rows=budgets["max_rows"], vmem_limit=budgets["vmem_limit"])
    return pos1, out


if __name__ == "__main__":
    key = jax.random.PRNGKey(0)
    B, N = 2, 16
    in_channel = 16
    nsample, nsample_q = 8, 8
    mlp1, mlp2 = [128, 64], [64]

    k1, k2, k3, k4, kp = jax.random.split(key, 5)
    pos1 = jax.random.normal(k1, (B, N, 3), jnp.float32)
    pos2 = jax.random.normal(k2, (B, N, 3), jnp.float32)
    feat1 = jax.random.normal(k3, (B, N, in_channel), jnp.float32)
    feat2 = jax.random.normal(k4, (B, N, in_channel), jnp.float32)

    params = init_params(kp, in_channel, mlp1, mlp2)

    pos_out, feat_out = flow_embedding_forward(params, pos1, pos2, feat1, feat2,
                                               nsample=nsample, nsample_q=nsample_q)
    jax.block_until_ready(feat_out)
    assert pos_out.shape == (B, N, 3), pos_out.shape
    assert feat_out.shape == (B, N, mlp2[-1]), feat_out.shape
    assert feat_out.dtype == jnp.float32
    print("KERNEL_OK")
</pallas_src>

<mosaic_0001>
module attributes {stable_mosaic.version = 11 : i64} {
  func.func @kernel(%arg0: i32, %arg1: i32, %arg2: i32, %arg3: memref<1x16x8xf32, #tpu.memory_space<vmem>>, %arg4: memref<1x8x16xf32, #tpu.memory_space<vmem>>, %arg5: memref<1x16x16xf32, #tpu.memory_space<vmem>>) attributes {dimension_semantics = [#tpu.dimension_semantics<parallel>, #tpu.dimension_semantics<parallel>, #tpu.dimension_semantics<parallel>], iteration_bounds = array<i64: 2, 1, 1>, scalar_prefetch = 0 : i64, scratch_operands = 0 : i64, tpu.core_type = #tpu.core_type<tc>, window_params = [{transform_indices = @transform_0, window_bounds = array<i64: 1, 16, 8>}, {transform_indices = @transform_1, window_bounds = array<i64: 1, 8, 16>}, {transform_indices = @transform_2, window_bounds = array<i64: 1, 16, 16>}]} {
    %c0 = arith.constant 0 : index
    %c0_0 = arith.constant 0 : index
    %c0_1 = arith.constant 0 : index
    %0 = vector.load %arg3[%c0, %c0_0, %c0_1] : memref<1x16x8xf32, #tpu.memory_space<vmem>>, vector<1x16x8xf32>
    %1 = vector.shape_cast %0 : vector<1x16x8xf32> to vector<16x8xf32>
    %c0_2 = arith.constant 0 : index
    %c0_3 = arith.constant 0 : index
    %c0_4 = arith.constant 0 : index
    %2 = vector.load %arg4[%c0_2, %c0_3, %c0_4] : memref<1x8x16xf32, #tpu.memory_space<vmem>>, vector<1x8x16xf32>
    %3 = vector.shape_cast %2 : vector<1x8x16xf32> to vector<8x16xf32>
    %cst = arith.constant dense<0.000000e+00> : vector<16x16xf32>
    %4 = tpu.matmul %1, %3, %cst {dimension_numbers = #tpu.dot_dimension_numbers<[1], [0], [0], [1], [0, 0, 1, 1], [], []>} : vector<16x8xf32>, vector<8x16xf32>, vector<16x16xf32> -> vector<16x16xf32>
    %5 = arith.mulf %1, %1 : vector<16x8xf32>
    %cst_5 = arith.constant dense<0.000000e+00> : vector<16xf32>
    %6 = vector.multi_reduction <add>, %5, %cst_5 [1] : vector<16x8xf32> to vector<16xf32>
    %7 = vector.shape_cast %6 : vector<16xf32> to vector<16x1xf32>
    %8 = arith.mulf %3, %3 : vector<8x16xf32>
    %cst_6 = arith.constant dense<0.000000e+00> : vector<16xf32>
    %9 = vector.multi_reduction <add>, %8, %cst_6 [0] : vector<8x16xf32> to vector<16xf32>
    %10 = vector.shape_cast %9 : vector<16xf32> to vector<1x16xf32>
    %cst_7 = arith.constant 2.000000e+00 : f32
    %11 = vector.broadcast %cst_7 : f32 to vector<16x16xf32>
    %12 = arith.mulf %11, %4 : vector<16x16xf32>
    %13 = vector.broadcast %7 : vector<16x1xf32> to vector<16x16xf32>
    %14 = arith.subf %12, %13 : vector<16x16xf32>
    %15 = vector.broadcast %10 : vector<1x16xf32> to vector<16x16xf32>
    %16 = arith.subf %14, %15 : vector<16x16xf32>
    %c0_8 = arith.constant 0 : index
    %c0_9 = arith.constant 0 : index
    %c0_10 = arith.constant 0 : index
    %17 = vector.load %arg5[%c0_8, %c0_9, %c0_10] : memref<1x16x16xf32, #tpu.memory_space<vmem>>, vector<1x16x16xf32>
    %18 = vector.shape_cast %17 : vector<1x16x16xf32> to vector<16x16xf32>
    %19 = vector.shape_cast %16 : vector<16x16xf32> to vector<1x16x16xf32>
    tpu.vector_store %arg5[%c0_8, %c0_9, %c0_10], %19 {strides = array<i32>} : memref<1x16x16xf32, #tpu.memory_space<vmem>>, vector<1x16x16xf32>,
    return
  }
  func.func @transform_0(%arg0: i32, %arg1: i32, %arg2: i32) -> (i32, i32, i32) {
    %c0_i32 = arith.constant 0 : i32
    %c0_i32_0 = arith.constant 0 : i32
    return %arg0, %arg1, %c0_i32 : i32, i32, i32
  }
  func.func @transform_1(%arg0: i32, %arg1: i32, %arg2: i32) -> (i32, i32, i32) {
    %c0_i32 = arith.constant 0 : i32
    %c0_i32_0 = arith.constant 0 : i32
    return %arg0, %c0_i32, %arg2 : i32, i32, i32
  }
  func.func @transform_2(%arg0: i32, %arg1: i32, %arg2: i32) -> (i32, i32, i32) {
    %c0_i32 = arith.constant 0 : i32
    return %arg0, %arg1, %arg2 : i32, i32, i32
  }
}

</mosaic_0001>

<bundles_post_ra>
// kernel: tpu_custom_call.1
= control target key start
LH: loop header
LB: loop body
LE: loop exit
PB: predicated region body
PF: predicated region fallthrough
CT: control target
= control target key end

     0   :  { %7 = vsyncpa [#allocation3], 0  ;;  %s737_s0 = inlined_call_operand.vmem [shape: f32[2,16,8], index: 0, kind: input, shape index: {}]   ;;  %s738_s1 = inlined_call_operand.vmem [shape: f32[2,8,16], index: 1, kind: input, shape index: {}]   ;;  %s739_s2 = inlined_call_operand.hbm [shape: f32[2,16,16], index: 2, kind: output, shape index: {}]  }
   0x1   :  { %9 = vsyncpa [#allocation3 + $0x1], 0  ;;  %s616_s9 = smov 0   ;;  %s618_s10 = smov 0  }
   0x2   :  { %s620_s11 = smov 0   ;;  %s622_s12 = smov 0  }
   0x3   :  { %s624_s13 = smov 0   ;;  %s626_s14 = smov 0  }
   0x4 LB: > { %s435_s15 = sadd.s32 4294967295, %s596_s14   ;;  %s436_s16 = sadd.s32 4294967294, %s596_s14   ;;  %s596_s14 = sphi %s626_s14, %s15_s14   ;;  %s592_s13 = sphi %s624_s13, %s746_s13   ;;  %s588_s12 = sphi %s622_s12, %s745_s12   ;;  %s584_s11 = sphi %s620_s11, %s744_s11   ;;  %s580_s10 = sphi %s618_s10, %s743_s10   ;;  %s576_s9 = sphi %s616_s9, %s742_s9  }
   0x5   : > { %s34_s17 = sadd.s32 1, %s592_s13  ;;  %s101_s18 = sadd.s32 1, %s584_s11 }
   0x6   : > { %p36_p0 = scmp.ge.s32.totalorder %s34_s17, 2  ;;  %p111_p1 = scmp.ne.s32.totalorder %s584_s11, %s580_s10 }
   0x7   : > { %p112_p2 = scmp.eq.s32.totalorder %s435_s15, 1  ;;  %p117_p3 = scmp.ne.s32.totalorder %s580_s10, %s576_s9 }
   0x8   : > { %s748_s17 = smov (%p36_p0, %s34_s17), 0  ;;  %p118_p5 = scmp.eq.s32.totalorder %s436_s16, 1 }
   0x9   : > { %p656_p4 = por %p112_p2, %p111_p1  ;;  %s94_s20 = ssub.s32 %s592_s13, %s748_s17 }
   0xa   : > { %p439_p6 = scmp.ge.s32.totalorder %s596_s14, 1  ;;  %p99_p7 = scmp.eq.s32.totalorder %s94_s20, 0 }
   0xb   : > { %p663_p8 = por %p118_p5, %p117_p3  ;;  %p159_p9 = scmp.lt.s32.totalorder %s596_s14, 3 }
   0xc   : > { %s669_s22 = scalar_select %p99_p7, %s584_s11, %s101_s18  }
   0xd   : > { %p160_p10 = pnand %p439_p6, %p159_p9 }
   0xe   : > { %p193_p11 = scmp.lt.s32.totalorder (!%p160_p10), %s588_s12, 1  ;;  %vm213_vm0 = vcmask (!%p160_p10), 64512   ;;  %vm304_vm1 = vcmask (!%p160_p10), 130048   ;;  %s189_s4 = sand.u32 (!%p160_p10), 1, %s580_s10  }
   0xf   : > { %163 = sbr.rel (%p160_p10) target bundleno = 263 (0x107), region = 28  ;;  %s440_s5 = sshll.u32 (!%p160_p10), %s189_s4, 4 }
  0x10   : > { %s452_s6 = sshll.u32 (!%p160_p10), %s588_s12, 8  ;;  %s191_s7 = scalar_lea.vmem (!%p160_p10), [#allocation2], %s440_s5 }
  0x11   : > { %s337_s8 = sshll.u32 (!%p160_p10), %s191_s7, 4  ;;  %s685_s18 = scalar_lea.hbm (!%p160_p10), %s739_s2, %s452_s6  ;;  %s687_s8 = int_to_ptr.vmem [resolvable:$true] %s337_s8 }
  0x12   : > { %s518_s20 = scalar_lea.vmem (!%p160_p10), %s687_s8, 256 }
  0x13   : > { %p519_p12 = scmp.ne.s32.totalorder (!%p160_p10), %s687_s8, %s518_s20 }
  0x15   : > { %p520_p13 = pnand (!%p160_p10), %p519_p12, %p656_p4 }
  0x16   : > { %s194_s23 = scalar_select %p193_p11, %s588_s12, 1 }
  0x17   : > { %s691_s12 = scalar_lea.sflag [#allocation3], %s189_s4  ;;  %p521_p0 = pneg %p520_p13 }
  0x18   : > { %s443_s24 = sshll.u32 %s194_s23, 3  ;;  %s451_s25 = sshll.u32 %s194_s23, 4 }
  0x19   : > { %s208_s28 = scalar_lea.vmem %s738_s1, %s443_s24  ;;  %s200_s3 = scalar_lea.vmem %s737_s0, %s451_s25 }
  0x1a   : > { %v212_v0 = vld [vmem:[%s208_s28] sm:$0xff]  ;;  %v211_v2 = vld [vmem:[%s200_s3 + $0x8] sm:$0xff]  ;;  %s598_s23 = smov [#allocation2]  }
  0x1b   : > { %v210_v1 = vld [vmem:[%s200_s3] sm:$0xff]  ;;  %456 = vmatprep.subr.mxu0 %v212_v0  ;;  %v296_v4 = vmul.f32 %v211_v2, %v211_v2  ;;  %v303_v7 = vmul.f32 %v212_v0, %v212_v0  ;;  %s522_s24 = sshll.u32 %s598_s23, 4  ;;  %s523_s24 = int_to_ptr.vmem [resolvable:$false] %s522_s24 }
  0x1c   : > { %458 = vmatprep.mubr.msk.f32.mxu0 %vm213_vm0, %v210_v1  ;;  %v295_v3 = vmul.f32 %v210_v1, %v210_v1  ;;  %457 = vmatpush3.msra.mxu0 %v212_v0  ;;  %s524_s25 = scalar_lea.vmem %s523_s24, 512  ;;  %p525_p1 = scmp.lt.s32.totalorder %s687_s8, %s523_s24 }
  0x1d   : > { %459 = vmatmul.mubr.msk.f32.vlgmr.msra.gmra.mrb[0].mxu0 %vm213_vm0, %v211_v2  ;;  %v300_v6 = vsel %vm213_vm0, %v296_v4, 0.0  ;;  %v305_v8 = vsel %vm304_vm1, %v303_v7, 0.0  ;;  %p526_p2 = scmp.lt.s32.totalorder %s524_s25, %s518_s20 }
  0x1e   : > { %v297_v5 = vsel %vm213_vm0, %v295_v3, 0.0  ;;  %v306_v9 = vrot.slane %v305_v8, 4 }
  0x1f   : > { %298 = vadd.xlane.f32.xlu0 %v297_v5  ;;  %p527_p3 = por %p526_p2, %p525_p1 }
  0x20   : > { %v307_v10 = vadd.f32 %v306_v9, %v305_v8 }
  0x21   : > { %p528_p5 = pnand %p527_p3, %p521_p0 }
  0x22   : > { %v308_v11 = vrot.slane %v307_v10, 2 }
  0x23   : > { %301 = vadd.xlane.f32.xlu0 %v300_v6 }
  0x24   : > { %v309_v12 = vadd.f32 %v308_v11, %v307_v10 }
  0x26   : > { %v310_v14 = vrot.slane %v309_v12, 1 }
  0x28   : > { %v311_v19 = vadd.f32 %v310_v14, %v309_v12 }
  0xac   : > { %v299_v13 = vpop.xlane.xlu0 %298 }
  0xb0   : > { %v302_v16 = vpop.xlane.xlu0 %301 }
  0xf0   : > { %v460_v15 = vpop.f32.mrb[0].mxu0 }
  0xf1   : > { %v313_v17 = vmul.f32 2.0, %v460_v15  ;;  %v286_v18 = vpop.f32.mrb[1].mxu0 }
  0xf2   : > { %v312_v20 = vmul.f32 2.0, %v286_v18 }
  0xf3   : > { %v315_v21 = vsub.f32 %v313_v17, %v302_v16 }
  0xf4   : > { %v314_v22 = vsub.f32 %v312_v20, %v299_v13 }
  0xf5   : > { %v317_v23 = vsub.f32 %v315_v21, %v311_v19 }
  0xf6   : > { %v316_v24 = vsub.f32 %v314_v22, %v311_v19 }
  0xf7   : > { %319 = vst.msk [vmem:[%s191_s7 + $0x8] sm:$0xff] %vm304_vm1, %v317_v23 }
  0xf8   : > { %318 = vst.msk [vmem:[%s191_s7] sm:$0xff] %vm304_vm1, %v316_v24 }
  0xf9   : > { %531 = shalt.err (!%p528_p5)
}
  0xfa   : > { %s532_s26 = scalar_lea.hbm %s685_s18, 256  ;;  %s536_s29 = scalar_lea.hbm %s739_s2, 512 }
  0xfb   : > { %p533_p6 = scmp.ne.s32.totalorder %s685_s18, %s532_s26  ;;  %p537_p10 = scmp.lt.u32.totalorder %s685_s18, %s739_s2 }
  0xfc   : > { %p538_p11 = scmp.lt.u32.totalorder %s536_s29, %s532_s26  ;;  %p540_p13 = scmp.lt.u32.totalorder %s532_s26, %s685_s18 }
  0xfd   : > { %p534_p7 = pnand %p533_p6, %p656_p4 }
  0xfe   : > { %p539_p12 = por %p538_p11, %p537_p10 }
  0xff   : > { %p535_p9 = pneg %p534_p7 }
 0x100   : > { %p541_p0 = por %p540_p13, %p539_p12 }
 0x102   : > { %p542_p1 = pnand %p541_p0, %p535_p9 }
 0x104   : > { %545 = shalt.err (!%p542_p1)
}
 0x105   : > { %s599_s4 = smov 128   ;;  %s600_s5 = smov 8  }
 0x106   : > { %461 = dma.vmem_to_hbm [thread:$0]  (%p656_p4), %s687_s8, 256, %s685_s18, %s691_s12, %s599_s4, %s599_s4, %s600_s5  }
 0x107 PF: > { %p467_p2 = scmp.ge.s32.totalorder %s596_s14, 2  ;;  %s352_s6 = sand.u32 1, %s576_s9  }
 0x108   : > { %s353_s7 = scalar_lea.sflag [#allocation3], %s352_s6 }
 0x109   : > { %p464_p3 = pnand %p467_p2, %p663_p8 }
 0x10b   : > { %571 = dma.done.wait (!%p464_p3), %s353_s7, 256  }
 0x10c   : > { %573 = vsyncadd (!%p464_p3), %s353_s7, 4294967040  ;;  %s15_s14 = sadd.s32 1, %s596_s14   ;;  %s742_s9 = smov %s580_s10 }
 0x10d   : > { %p12_p5 = scmp.ge.s32.totalorder %s15_s14, 4   ;;  %s743_s10 = smov %s584_s11 }
 0x10e   : > { %s744_s11 = smov %s669_s22  ;;  %s745_s12 = smov %s592_s13 }
 0x10f   : > { %s746_s13 = smov %s748_s17  ;;  %14 = sbr.rel (!%p12_p5) target bundleno = 4 (0x4), region = 66 }
 0x116   :  { %358 = vsyncpa [#allocation3], 1 }
 0x117   :  { %360 = vsyncpa [#allocation3 + $0x1], 1 }

</bundles_post_ra>
